<compile_context>
chip_gen: v6e
topology: v6e:2x2x1
jax: 0.10.0
libtpu: 0.0.40
codegen_flags: <defaults>
</compile_context>

<pallas_src>
import math
from functools import partial

import numpy as np
import jax
import jax.numpy as jnp
from jax.experimental import pallas as pl
from jax.experimental.pallas import tpu as pltpu


def _round_up(x, m):
    return (x + m - 1) // m * m


def _cdiv(a, b):
    return -(-a // b)


# ----------------------------------------------------------------------------
# Static host-side glue: exact port of input_matrix_wpn_new (numpy).
# ----------------------------------------------------------------------------
def input_matrix_wpn_new(inH, inW, scale, add_scale=True):
    outH, outW = int(scale * inH), int(scale * inW)
    scale_int = int(math.ceil(scale))

    h_offset = np.ones((inH, scale_int, 1), np.float32)
    mask_h = np.zeros((inH, scale_int, 1), np.float32)
    w_offset = np.ones((1, inW, scale_int), np.float32)
    mask_w = np.zeros((1, inW, scale_int), np.float32)

    h_project_coord = np.arange(0, outH, 1, dtype=np.float32) * (1.0 / scale)
    int_h_project_coord = np.floor(h_project_coord)
    offset_h_coord = h_project_coord - int_h_project_coord
    int_h_project_coord = int_h_project_coord.astype(np.int32)

    w_project_coord = np.arange(0, outW, 1, dtype=np.float32) * (1.0 / scale)
    int_w_project_coord = np.floor(w_project_coord)
    offset_w_coord = w_project_coord - int_w_project_coord
    int_w_project_coord = int_w_project_coord.astype(np.int32)

    flag, number = 0, 0
    for i in range(outH):
        if int_h_project_coord[i] == number:
            h_offset[int_h_project_coord[i], flag, 0] = offset_h_coord[i]
            mask_h[int_h_project_coord[i], flag, 0] = 1
            flag += 1
        else:
            h_offset[int_h_project_coord[i], 0, 0] = offset_h_coord[i]
            mask_h[int_h_project_coord[i], 0, 0] = 1
            number += 1
            flag = 1

    flag, number = 0, 0
    for i in range(outW):
        if int_w_project_coord[i] == number:
            w_offset[0, int_w_project_coord[i], flag] = offset_w_coord[i]
            mask_w[0, int_w_project_coord[i], flag] = 1
            flag += 1
        else:
            w_offset[0, int_w_project_coord[i], 0] = offset_w_coord[i]
            mask_w[0, int_w_project_coord[i], 0] = 1
            number += 1
            flag = 1

    h_offset_coord = np.tile(h_offset, (1, 1, scale_int * inW)).reshape(-1, scale_int * inW, 1)
    w_offset_coord = np.tile(w_offset, (scale_int * inH, 1, 1)).reshape(-1, scale_int * inW, 1)
    mask_h = np.tile(mask_h, (1, 1, scale_int * inW)).reshape(-1, scale_int * inW, 1)
    mask_w = np.tile(mask_w, (scale_int * inH, 1, 1)).reshape(-1, scale_int * inW, 1)

    pos_mat = np.concatenate((h_offset_coord, w_offset_coord), axis=2)
    mask_mat = np.sum(np.concatenate((mask_h, mask_w), axis=2), axis=2).reshape(
        scale_int * inH, scale_int * inW)
    mask_mat = (mask_mat == 2)

    h, w, _ = pos_mat.shape
    i = 1
    while i < h and pos_mat[i, 0, 0] >= 1e-06:
        i += 1
    j = 1
    while j < w and pos_mat[0, j, 1] >= 1e-06:
        j += 1

    pos_mat_small = pos_mat[0:i, 0:j, :].reshape(1, -1, 2)
    if add_scale:
        scale_col = np.full((1, pos_mat_small.shape[1], 1), 1.0 / scale, np.float32)
        pos_mat_small = np.concatenate((scale_col, pos_mat_small), axis=2)
    return pos_mat_small.astype(np.float32), mask_mat


# ----------------------------------------------------------------------------
# Pallas kernel 1: Pos2Weight MLP  (Linear(3,256) -> ReLU -> Linear(256, k*k*C*outC))
# Tiny / not a hot path; dims padded so all loads/stores are unmasked.
# ----------------------------------------------------------------------------
def _p2w_kernel(pos_ref, w1_ref, b1_ref, w2_ref, b2_ref, out_ref):
    h = jnp.dot(pos_ref[...], w1_ref[...], preferred_element_type=jnp.float32)
    h = jnp.maximum(h + b1_ref[...], 0.0)
    out_ref[...] = jnp.dot(h, w2_ref[...], preferred_element_type=jnp.float32) + b2_ref[...]


def pos2weight_pallas(pos, w1, b1, w2, b2):
    P, F = pos.shape           # F == 3
    H = w1.shape[1]            # 256 (already lane-aligned)
    D = w2.shape[1]            # k*k*C*outC
    P_pad = _round_up(P, 8)
    F_pad = _round_up(F, 8)
    D_pad = _round_up(D, 128)

    pos_p = jnp.zeros((P_pad, F_pad), jnp.float32).at[:P, :F].set(pos)
    w1_p = jnp.zeros((F_pad, H), jnp.float32).at[:F, :].set(w1)
    w2_p = jnp.zeros((H, D_pad), jnp.float32).at[:, :D].set(w2)
    b2_p = jnp.zeros((1, D_pad), jnp.float32).at[:, :D].set(b2.reshape(1, -1))

    out = pl.pallas_call(
        _p2w_kernel,
        out_shape=jax.ShapeDtypeStruct((P_pad, D_pad), jnp.float32),
    )(pos_p, w1_p, b1.reshape(1, -1), w2_p, b2_p)
    return out[:P, :D]


# ----------------------------------------------------------------------------
# Pallas kernel 2: FUSED im2col + per-subpixel local conv (pixel-invariant weights)
#
#   For each image band (haloed, zero-padded, flattened row-major with padded
#   row stride Wp = W+2, lane-padded to Lb % 128 == 0):
#       out[po, p] = sum_s ( W_s @ x )[po, p + off_s],  off_s = (ki-1)*Wp + (kj-1)
#   implemented as 9 MXU matmuls + 9 XLU lane-rolls of the small (PO, Lb) result,
#   accumulated in f32.  Border / padding positions of the flat grid are garbage
#   and are discarded by the wrapper (interior extraction).
# ----------------------------------------------------------------------------
def _fused_conv_kernel(w_ref, x_ref, out_ref, *, offsets):
    # w_ref:   (KK, PO_pad, C_pad)   resident (constant block index)
    # x_ref:   (1, 1, C_pad, Lb)     one haloed, flattened image band
    # out_ref: (1, 1, PO_pad, Lb)    lane-dense output on the padded flat grid
    x = x_ref[0, 0]                                   # (C_pad, Lb)
    lb = out_ref.shape[-1]
    po_pad = out_ref.shape[-2]
    acc = jnp.zeros((po_pad, lb), jnp.float32)
    for s, off in enumerate(offsets):
        y = jnp.dot(w_ref[s], x, preferred_element_type=jnp.float32)   # MXU
        if off != 0:
            y = pltpu.roll(y, shift=(-off) % lb, axis=1)               # XLU lane rotate
        acc = acc + y                                                  # VPU f32
    out_ref[0, 0] = acc.astype(out_ref.dtype)


def fused_local_conv_pallas(w_stack, x_slabs, offsets):
    KK, PO_pad, C_pad = w_stack.shape
    N, NB, _, Lb = x_slabs.shape
    itemsize = x_slabs.dtype.itemsize

    # Generation-aware VMEM budget: double-buffered slab + output, resident
    # weight, acc + matmul/roll temporaries.
    ws = (2 * C_pad * Lb * itemsize
          + 2 * PO_pad * Lb * 4
          + KK * PO_pad * C_pad * itemsize
          + 3 * PO_pad * Lb * 4)
    vmem_limit = int(min(56 << 20, max(32 << 20, ws + (4 << 20))))

    flops = 2 * N * NB * KK * PO_pad * C_pad * Lb
    bytes_accessed = (N * NB * C_pad * Lb * itemsize
                      + N * NB * PO_pad * Lb * 4
                      + KK * PO_pad * C_pad * itemsize)

    kernel = partial(_fused_conv_kernel, offsets=tuple(int(o) for o in offsets))
    return pl.pallas_call(
        kernel,
        out_shape=jax.ShapeDtypeStruct((N, NB, PO_pad, Lb), jnp.float32),
        grid=(N, NB),
        in_specs=[
            pl.BlockSpec((KK, PO_pad, C_pad), lambda n, t: (0, 0, 0)),  # resident weights
            pl.BlockSpec((1, 1, C_pad, Lb), lambda n, t: (n, t, 0, 0)),
        ],
        out_specs=pl.BlockSpec((1, 1, PO_pad, Lb), lambda n, t: (n, t, 0, 0)),
        compiler_params=pltpu.CompilerParams(
            dimension_semantics=("parallel", "parallel"),
            vmem_limit_bytes=vmem_limit),
        cost_estimate=pl.CostEstimate(flops=flops, transcendentals=0,
                                      bytes_accessed=bytes_accessed),
    )(w_stack, x_slabs)


# ----------------------------------------------------------------------------
# Helpers
# ----------------------------------------------------------------------------
def _pick_band_rows(H, W, C_pad, PO_pad, itemsize, n_batch,
                    budget_bytes=12 << 20, min_steps=4):
    """Largest band height whose VMEM working set fits the budget; then split
    further so the grid has enough steps for megacore + pipeline warm-up."""
    Wp = W + 2

    def ws(th):
        lb = _round_up((th + 2) * Wp, 128)
        return 2 * C_pad * lb * itemsize + 4 * PO_pad * lb * 4

    th = H
    while th > 1 and ws(th) > budget_bytes:
        th = (th + 1) // 2
    while th > 4 and n_batch * _cdiv(H, th) < min_steps:
        th = (th + 1) // 2
    return th


def _build_band_slabs(x, th, n_bands, compute_dtype, c_pad):
    """Zero-pad x (padding=1), cast to compute_dtype first, slice into haloed
    row bands, flatten each band row-major and lane-pad to a multiple of 128."""
    N, C, H, W = x.shape
    Wp = W + 2
    Hp = n_bands * th + 2
    xp = jnp.zeros((N, C, Hp, Wp), compute_dtype)
    xp = xp.at[:, :, 1:H + 1, 1:W + 1].set(x.astype(compute_dtype))
    slabs = jnp.stack([xp[:, :, t * th:t * th + th + 2, :] for t in range(n_bands)],
                      axis=1)                                   # (N, NB, C, th+2, Wp)
    l_act = (th + 2) * Wp
    lb = _round_up(l_act, 128)
    slabs = slabs.reshape(N, n_bands, C, l_act)
    out = jnp.zeros((N, n_bands, c_pad, lb), compute_dtype)
    out = out.at[:, :, :C, :l_act].set(slabs)
    return out, lb


def _im2col_nkhw(x, k):
    """Pure-JAX im2col in torch-unfold layout (N, C*k*k, H*W); reference path only."""
    N, C, H, W = x.shape
    xp = jnp.pad(x, ((0, 0), (0, 0), (1, 1), (1, 1)))   # padding=1, as in nn.functional.unfold
    patches = jnp.stack(
        [xp[:, :, ki:ki + H, kj:kj + W] for ki in range(k) for kj in range(k)],
        axis=2)                                          # (N, C, k*k, H, W)
    return patches.reshape(N, C * k * k, H * W)          # (N, K, HW)


def _repeat_weight(local_weight, scale_int, inH, inW):
    """Exact port of MetaUpSampler.repeat_weight (general / pixel-variant path)."""
    P = local_weight.shape[0]
    kk = int(math.sqrt(P))
    outh, outw = inH * scale_int, inW * scale_int
    w3 = local_weight.reshape(kk, kk, -1)
    scale_h = (outh + kk - 1) // kk
    scale_w = (outw + kk - 1) // kk
    return jnp.tile(w3, (scale_h, scale_w, 1))[:outh, :outw, :]


# ----------------------------------------------------------------------------
# Full MetaUpSampler forward.
# ----------------------------------------------------------------------------
def meta_upsampler_forward(lr_features, sr_scale, params, kernel_size=3,
                           n_colors=3, use_pallas=True,
                           compute_dtype=jnp.float32):
    N, C, inH, inW = lr_features.shape
    scale_int = int(math.ceil(sr_scale))
    outC, k = n_colors, kernel_size
    HW = inH * inW

    # ---- pos / mask (static, host-side)
    pos_np, mask_np = input_matrix_wpn_new(inH, inW, sr_scale)
    pos = jnp.asarray(pos_np.reshape(pos_np.shape[1], -1))            # (P, 3)
    P = int(pos.shape[0])
    kk = int(math.sqrt(P))

    # ---- Pos2Weight MLP
    if use_pallas:
        local_weight = pos2weight_pallas(pos, params["w1"], params["b1"],
                                         params["w2"], params["b2"])  # (P, C*k*k*outC)
    else:
        local_weight = (jnp.maximum(pos @ params["w1"] + params["b1"][None], 0.0)
                        @ params["w2"] + params["b2"][None])

    # Pixel-invariance of the local weights holds exactly when the repeat_weight
    # tile period equals scale_int (always true for integer scales).
    pixel_invariant = (kk * kk == P) and (kk == scale_int)

    if use_pallas and pixel_invariant:
        # ---- fused im2col + local conv (no cols tensor in HBM)
        PO = P * outC
        itemsize = jnp.dtype(compute_dtype).itemsize
        sub = max(8, 32 // itemsize)                  # sublane tile: 8 f32 / 16 bf16
        C_pad = _round_up(C, sub)
        PO_pad = _round_up(PO, sub)

        # Weight stack: w_stack[ki*k+kj, p*outC+o, c] = local_weight[p, (c,ki,kj,o)]
        lw5 = local_weight.reshape(P, C, k, k, outC)
        w_stack = jnp.transpose(lw5, (2, 3, 0, 4, 1)).reshape(k * k, PO, C)
        w_pad = jnp.zeros((k * k, PO_pad, C_pad), compute_dtype)
        w_pad = w_pad.at[:, :PO, :C].set(w_stack.astype(compute_dtype))

        TH = _pick_band_rows(inH, inW, C_pad, PO_pad, itemsize, N)
        n_bands = _cdiv(inH, TH)
        slabs, Lb = _build_band_slabs(lr_features, TH, n_bands, compute_dtype, C_pad)

        Wp = inW + 2
        offsets = [(ki - 1) * Wp + (kj - 1) for ki in range(k) for kj in range(k)]

        out_g = fused_local_conv_pallas(w_pad, slabs, offsets)        # (N, NB, PO_pad, Lb)

        # Interior extraction + de-banding (cheap passes over the small output).
        L_act = (TH + 2) * Wp
        out5 = out_g[:, :, :PO, :L_act].reshape(N, n_bands, PO, TH + 2, Wp)
        inner = out5[:, :, :, 1:TH + 1, 1:inW + 1]                    # (N, NB, PO, TH, W)
        outp = inner.transpose(0, 2, 1, 3, 4).reshape(N, PO, n_bands * TH, inW)[:, :, :inH, :]
        out = outp.reshape(N, P, outC, inH, inW)
    else:
        # General (pixel-variant weight) fallback — exact port of the PyTorch math.
        # TODO(synk): no fused Pallas path for the pixel-variant case (non-integer scales).
        cols_t = _im2col_nkhw(lr_features, k)                          # (N, K, HW)
        w3 = _repeat_weight(local_weight, scale_int, inH, inW)
        lw = w3.reshape(inH, scale_int, inW, scale_int, -1, outC)
        lw = lw.transpose(1, 3, 0, 2, 4, 5).reshape(scale_int ** 2, HW, -1, outC)
        cols = cols_t.transpose(0, 2, 1)                               # (N, HW, K)
        out = jnp.einsum("nmk,pmko->npom", cols, lw)                   # (N, s^2, O, HW)
        out = out.reshape(N, scale_int ** 2, outC, inH, inW)

    # ---- reassemble to the scale_int grid (depth-to-space interleave)
    # TODO(synk): if xprof shows this transpose dominating, move the s-interleave
    # into a small follow-up Pallas pass with strided stores.
    out = out.reshape(N, scale_int, scale_int, outC, inH, inW)
    out = out.transpose(0, 3, 4, 1, 5, 2)                              # (N, O, H, s, W, s)
    out_grid = out.reshape(N, outC, scale_int * inH, scale_int * inW)

    outH, outW = int(sr_scale * inH), int(sr_scale * inW)
    if mask_np.all() and out_grid.shape[2] == outH and out_grid.shape[3] == outW:
        return out_grid                                                # integer scale: mask is identity
    sel = np.nonzero(mask_np.reshape(-1))[0]                           # static indices
    out_final = out_grid.reshape(N, outC, -1)[:, :, sel]
    return out_final.reshape(N, outC, outH, outW)


# ----------------------------------------------------------------------------
if __name__ == "__main__":
    key = jax.random.PRNGKey(0)
    N, C, inH, inW = 2, 4, 16, 16        # N, n_feats, spatial
    n_colors, kernel_size = 3, 3
    sr_scale = 2.0

    D = kernel_size * kernel_size * C * n_colors
    k1, k2, k3, k4, k5 = jax.random.split(key, 5)
    # Deterministic synthetic Pos2Weight params (stored transposed: x @ W + b).
    params = dict(
        w1=0.1 * jax.random.normal(k1, (3, 256), jnp.float32),
        b1=0.1 * jax.random.normal(k2, (256,), jnp.float32),
        w2=0.05 * jax.random.normal(k3, (256, D), jnp.float32),
        b2=0.05 * jax.random.normal(k4, (D,), jnp.float32),
    )
    x = jax.random.normal(k5, (N, C, inH, inW), jnp.float32)

    fwd = jax.jit(meta_upsampler_forward,
                  static_argnames=("sr_scale", "kernel_size", "n_colors",
                                   "use_pallas", "compute_dtype"))

    # Pallas fast path (fused im2col + conv, lane-dense banded output), f32.
    out = fwd(x, sr_scale=sr_scale, params=params, kernel_size=kernel_size,
              n_colors=n_colors, use_pallas=True, compute_dtype=jnp.float32)
    out = jax.block_until_ready(out)
    assert out.shape == (N, n_colors, int(sr_scale * inH), int(sr_scale * inW)), out.shape

    # Pure-JAX reference using the original (un-deduped, un-fused) math.
    ref = fwd(x, sr_scale=sr_scale, params=params, kernel_size=kernel_size,
              n_colors=n_colors, use_pallas=False, compute_dtype=jnp.float32)
    ref = jax.block_until_ready(ref)
    np.testing.assert_allclose(np.asarray(out), np.asarray(ref), rtol=5e-5, atol=2e-4)

    # bf16 operand path (f32 MXU accumulate) — recommended default on v6e/v7x.
    out_bf16 = fwd(x, sr_scale=sr_scale, params=params, kernel_size=kernel_size,
                   n_colors=n_colors, use_pallas=True, compute_dtype=jnp.bfloat16)
    out_bf16 = jax.block_until_ready(out_bf16)
    np.testing.assert_allclose(np.asarray(out_bf16), np.asarray(ref), rtol=3e-2, atol=3e-2)

    print("KERNEL_OK")
</pallas_src>

<mosaic_0001>
module attributes {stable_mosaic.version = 11 : i64} {
  func.func @_p2w_kernel(%arg0: memref<8x8xf32, #tpu.memory_space<vmem>>, %arg1: memref<8x256xf32, #tpu.memory_space<vmem>>, %arg2: memref<1x256xf32, #tpu.memory_space<vmem>>, %arg3: memref<256x128xf32, #tpu.memory_space<vmem>>, %arg4: memref<1x128xf32, #tpu.memory_space<vmem>>, %arg5: memref<8x128xf32, #tpu.memory_space<vmem>>) attributes {dimension_semantics = [], scalar_prefetch = 0 : i64, scratch_operands = 0 : i64, tpu.core_type = #tpu.core_type<tc>} {
    %c0 = arith.constant 0 : index
    %c0_0 = arith.constant 0 : index
    %0 = vector.load %arg0[%c0, %c0_0] : memref<8x8xf32, #tpu.memory_space<vmem>>, vector<8x8xf32>
    %c0_1 = arith.constant 0 : index
    %c0_2 = arith.constant 0 : index
    %1 = vector.load %arg1[%c0_1, %c0_2] : memref<8x256xf32, #tpu.memory_space<vmem>>, vector<8x256xf32>
    %cst = arith.constant dense<0.000000e+00> : vector<8x256xf32>
    %2 = tpu.matmul %0, %1, %cst {dimension_numbers = #tpu.dot_dimension_numbers<[1], [0], [0], [1], [0, 0, 1, 1], [], []>} : vector<8x8xf32>, vector<8x256xf32>, vector<8x256xf32> -> vector<8x256xf32>
    %c0_3 = arith.constant 0 : index
    %c0_4 = arith.constant 0 : index
    %3 = vector.load %arg2[%c0_3, %c0_4] : memref<1x256xf32, #tpu.memory_space<vmem>>, vector<1x256xf32>
    %4 = vector.broadcast %3 : vector<1x256xf32> to vector<8x256xf32>
    %5 = arith.addf %2, %4 : vector<8x256xf32>
    %cst_5 = arith.constant 0.000000e+00 : f32
    %6 = vector.broadcast %cst_5 : f32 to vector<8x256xf32>
    %7 = arith.maximumf %5, %6 : vector<8x256xf32>
    %c0_6 = arith.constant 0 : index
    %c0_7 = arith.constant 0 : index
    %8 = vector.load %arg3[%c0_6, %c0_7] : memref<256x128xf32, #tpu.memory_space<vmem>>, vector<256x128xf32>
    %cst_8 = arith.constant dense<0.000000e+00> : vector<8x128xf32>
    %9 = tpu.matmul %7, %8, %cst_8 {dimension_numbers = #tpu.dot_dimension_numbers<[1], [0], [0], [1], [0, 0, 1, 1], [], []>} : vector<8x256xf32>, vector<256x128xf32>, vector<8x128xf32> -> vector<8x128xf32>
    %c0_9 = arith.constant 0 : index
    %c0_10 = arith.constant 0 : index
    %10 = vector.load %arg4[%c0_9, %c0_10] : memref<1x128xf32, #tpu.memory_space<vmem>>, vector<1x128xf32>
    %11 = vector.broadcast %10 : vector<1x128xf32> to vector<8x128xf32>
    %12 = arith.addf %9, %11 : vector<8x128xf32>
    %c0_11 = arith.constant 0 : index
    %c0_12 = arith.constant 0 : index
    %13 = vector.load %arg5[%c0_11, %c0_12] : memref<8x128xf32, #tpu.memory_space<vmem>>, vector<8x128xf32>
    tpu.vector_store %arg5[%c0_11, %c0_12], %12 {strides = array<i32>} : memref<8x128xf32, #tpu.memory_space<vmem>>, vector<8x128xf32>,
    return
  }
}

module attributes {stable_mosaic.version = 11 : i64} {
  func.func @_fused_conv_kernel(%arg0: i32, %arg1: i32, %arg2: memref<9x16x8xf32, #tpu.memory_space<vmem>>, %arg3: memref<1x1x8x256xf32, #tpu.memory_space<vmem>>, %arg4: memref<1x1x16x256xf32, #tpu.memory_space<vmem>>) attributes {dimension_semantics = [#tpu.dimension_semantics<parallel>, #tpu.dimension_semantics<parallel>], iteration_bounds = array<i64: 2, 2>, scalar_prefetch = 0 : i64, scratch_operands = 0 : i64, tpu.core_type = #tpu.core_type<tc>, window_params = [{pipeline_mode = #tpu.pipeline_mode<synchronous>, transform_indices = @transform_0, window_bounds = array<i64: 9, 16, 8>}, {transform_indices = @transform_1, window_bounds = array<i64: 1, 1, 8, 256>}, {transform_indices = @transform_2, window_bounds = array<i64: 1, 1, 16, 256>}]} {
    %c0 = arith.constant 0 : index
    %c0_0 = arith.constant 0 : index
    %c0_1 = arith.constant 0 : index
    %c0_2 = arith.constant 0 : index
    %0 = vector.load %arg3[%c0, %c0_0, %c0_1, %c0_2] : memref<1x1x8x256xf32, #tpu.memory_space<vmem>>, vector<1x1x8x256xf32>
    %1 = vector.shape_cast %0 : vector<1x1x8x256xf32> to vector<8x256xf32>
    %cst = arith.constant 0.000000e+00 : f32
    %2 = vector.broadcast %cst : f32 to vector<16x256xf32>
    %c0_3 = arith.constant 0 : index
    %c0_4 = arith.constant 0 : index
    %c0_5 = arith.constant 0 : index
    %3 = vector.load %arg2[%c0_3, %c0_4, %c0_5] : memref<9x16x8xf32, #tpu.memory_space<vmem>>, vector<1x16x8xf32>
    %4 = vector.shape_cast %3 : vector<1x16x8xf32> to vector<16x8xf32>
    %cst_6 = arith.constant dense<0.000000e+00> : vector<16x256xf32>
    %5 = tpu.matmul %4, %1, %cst_6 {dimension_numbers = #tpu.dot_dimension_numbers<[1], [0], [0], [1], [0, 0, 1, 1], [], []>} : vector<16x8xf32>, vector<8x256xf32>, vector<16x256xf32> -> vector<16x256xf32>
    %c19_i32 = arith.constant 19 : i32
    %6 = tpu.dynamic_rotate %5 by %c19_i32 dim 1 : vector<16x256xf32>, i32 -> vector<16x256xf32>
    %7 = arith.addf %2, %6 : vector<16x256xf32>
    %c1 = arith.constant 1 : index
    %c0_7 = arith.constant 0 : index
    %c0_8 = arith.constant 0 : index
    %8 = vector.load %arg2[%c1, %c0_7, %c0_8] : memref<9x16x8xf32, #tpu.memory_space<vmem>>, vector<1x16x8xf32>
    %9 = vector.shape_cast %8 : vector<1x16x8xf32> to vector<16x8xf32>
    %cst_9 = arith.constant dense<0.000000e+00> : vector<16x256xf32>
    %10 = tpu.matmul %9, %1, %cst_9 {dimension_numbers = #tpu.dot_dimension_numbers<[1], [0], [0], [1], [0, 0, 1, 1], [], []>} : vector<16x8xf32>, vector<8x256xf32>, vector<16x256xf32> -> vector<16x256xf32>
    %c18_i32 = arith.constant 18 : i32
    %11 = tpu.dynamic_rotate %10 by %c18_i32 dim 1 : vector<16x256xf32>, i32 -> vector<16x256xf32>
    %12 = arith.addf %7, %11 : vector<16x256xf32>
    %c2 = arith.constant 2 : index
    %c0_10 = arith.constant 0 : index
    %c0_11 = arith.constant 0 : index
    %13 = vector.load %arg2[%c2, %c0_10, %c0_11] : memref<9x16x8xf32, #tpu.memory_space<vmem>>, vector<1x16x8xf32>
    %14 = vector.shape_cast %13 : vector<1x16x8xf32> to vector<16x8xf32>
    %cst_12 = arith.constant dense<0.000000e+00> : vector<16x256xf32>
    %15 = tpu.matmul %14, %1, %cst_12 {dimension_numbers = #tpu.dot_dimension_numbers<[1], [0], [0], [1], [0, 0, 1, 1], [], []>} : vector<16x8xf32>, vector<8x256xf32>, vector<16x256xf32> -> vector<16x256xf32>
    %c17_i32 = arith.constant 17 : i32
    %16 = tpu.dynamic_rotate %15 by %c17_i32 dim 1 : vector<16x256xf32>, i32 -> vector<16x256xf32>
    %17 = arith.addf %12, %16 : vector<16x256xf32>
    %c3 = arith.constant 3 : index
    %c0_13 = arith.constant 0 : index
    %c0_14 = arith.constant 0 : index
    %18 = vector.load %arg2[%c3, %c0_13, %c0_14] : memref<9x16x8xf32, #tpu.memory_space<vmem>>, vector<1x16x8xf32>
    %19 = vector.shape_cast %18 : vector<1x16x8xf32> to vector<16x8xf32>
    %cst_15 = arith.constant dense<0.000000e+00> : vector<16x256xf32>
    %20 = tpu.matmul %19, %1, %cst_15 {dimension_numbers = #tpu.dot_dimension_numbers<[1], [0], [0], [1], [0, 0, 1, 1], [], []>} : vector<16x8xf32>, vector<8x256xf32>, vector<16x256xf32> -> vector<16x256xf32>
    %c1_i32 = arith.constant 1 : i32
    %21 = tpu.dynamic_rotate %20 by %c1_i32 dim 1 : vector<16x256xf32>, i32 -> vector<16x256xf32>
    %22 = arith.addf %17, %21 : vector<16x256xf32>
    %c4 = arith.constant 4 : index
    %c0_16 = arith.constant 0 : index
    %c0_17 = arith.constant 0 : index
    %23 = vector.load %arg2[%c4, %c0_16, %c0_17] : memref<9x16x8xf32, #tpu.memory_space<vmem>>, vector<1x16x8xf32>
    %24 = vector.shape_cast %23 : vector<1x16x8xf32> to vector<16x8xf32>
    %cst_18 = arith.constant dense<0.000000e+00> : vector<16x256xf32>
    %25 = tpu.matmul %24, %1, %cst_18 {dimension_numbers = #tpu.dot_dimension_numbers<[1], [0], [0], [1], [0, 0, 1, 1], [], []>} : vector<16x8xf32>, vector<8x256xf32>, vector<16x256xf32> -> vector<16x256xf32>
    %26 = arith.addf %22, %25 : vector<16x256xf32>
    %c5 = arith.constant 5 : index
    %c0_19 = arith.constant 0 : index
    %c0_20 = arith.constant 0 : index
    %27 = vector.load %arg2[%c5, %c0_19, %c0_20] : memref<9x16x8xf32, #tpu.memory_space<vmem>>, vector<1x16x8xf32>
    %28 = vector.shape_cast %27 : vector<1x16x8xf32> to vector<16x8xf32>
    %cst_21 = arith.constant dense<0.000000e+00> : vector<16x256xf32>
    %29 = tpu.matmul %28, %1, %cst_21 {dimension_numbers = #tpu.dot_dimension_numbers<[1], [0], [0], [1], [0, 0, 1, 1], [], []>} : vector<16x8xf32>, vector<8x256xf32>, vector<16x256xf32> -> vector<16x256xf32>
    %c255_i32 = arith.constant 255 : i32
    %30 = tpu.dynamic_rotate %29 by %c255_i32 dim 1 : vector<16x256xf32>, i32 -> vector<16x256xf32>
    %31 = arith.addf %26, %30 : vector<16x256xf32>
    %c6 = arith.constant 6 : index
    %c0_22 = arith.constant 0 : index
    %c0_23 = arith.constant 0 : index
    %32 = vector.load %arg2[%c6, %c0_22, %c0_23] : memref<9x16x8xf32, #tpu.memory_space<vmem>>, vector<1x16x8xf32>
    %33 = vector.shape_cast %32 : vector<1x16x8xf32> to vector<16x8xf32>
    %cst_24 = arith.constant dense<0.000000e+00> : vector<16x256xf32>
    %34 = tpu.matmul %33, %1, %cst_24 {dimension_numbers = #tpu.dot_dimension_numbers<[1], [0], [0], [1], [0, 0, 1, 1], [], []>} : vector<16x8xf32>, vector<8x256xf32>, vector<16x256xf32> -> vector<16x256xf32>
    %c239_i32 = arith.constant 239 : i32
    %35 = tpu.dynamic_rotate %34 by %c239_i32 dim 1 : vector<16x256xf32>, i32 -> vector<16x256xf32>
    %36 = arith.addf %31, %35 : vector<16x256xf32>
    %c7 = arith.constant 7 : index
    %c0_25 = arith.constant 0 : index
    %c0_26 = arith.constant 0 : index
    %37 = vector.load %arg2[%c7, %c0_25, %c0_26] : memref<9x16x8xf32, #tpu.memory_space<vmem>>, vector<1x16x8xf32>
    %38 = vector.shape_cast %37 : vector<1x16x8xf32> to vector<16x8xf32>
    %cst_27 = arith.constant dense<0.000000e+00> : vector<16x256xf32>
    %39 = tpu.matmul %38, %1, %cst_27 {dimension_numbers = #tpu.dot_dimension_numbers<[1], [0], [0], [1], [0, 0, 1, 1], [], []>} : vector<16x8xf32>, vector<8x256xf32>, vector<16x256xf32> -> vector<16x256xf32>
    %c238_i32 = arith.constant 238 : i32
    %40 = tpu.dynamic_rotate %39 by %c238_i32 dim 1 : vector<16x256xf32>, i32 -> vector<16x256xf32>
    %41 = arith.addf %36, %40 : vector<16x256xf32>
    %c8 = arith.constant 8 : index
    %c0_28 = arith.constant 0 : index
    %c0_29 = arith.constant 0 : index
    %42 = vector.load %arg2[%c8, %c0_28, %c0_29] : memref<9x16x8xf32, #tpu.memory_space<vmem>>, vector<1x16x8xf32>
    %43 = vector.shape_cast %42 : vector<1x16x8xf32> to vector<16x8xf32>
    %cst_30 = arith.constant dense<0.000000e+00> : vector<16x256xf32>
    %44 = tpu.matmul %43, %1, %cst_30 {dimension_numbers = #tpu.dot_dimension_numbers<[1], [0], [0], [1], [0, 0, 1, 1], [], []>} : vector<16x8xf32>, vector<8x256xf32>, vector<16x256xf32> -> vector<16x256xf32>
    %c237_i32 = arith.constant 237 : i32
    %45 = tpu.dynamic_rotate %44 by %c237_i32 dim 1 : vector<16x256xf32>, i32 -> vector<16x256xf32>
    %46 = arith.addf %41, %45 : vector<16x256xf32>
    %c0_31 = arith.constant 0 : index
    %c0_32 = arith.constant 0 : index
    %c0_33 = arith.constant 0 : index
    %c0_34 = arith.constant 0 : index
    %47 = vector.load %arg4[%c0_31, %c0_32, %c0_33, %c0_34] : memref<1x1x16x256xf32, #tpu.memory_space<vmem>>, vector<1x1x16x256xf32>
    %48 = vector.shape_cast %47 : vector<1x1x16x256xf32> to vector<16x256xf32>
    %49 = vector.shape_cast %46 : vector<16x256xf32> to vector<1x1x16x256xf32>
    tpu.vector_store %arg4[%c0_31, %c0_32, %c0_33, %c0_34], %49 {strides = array<i32>} : memref<1x1x16x256xf32, #tpu.memory_space<vmem>>, vector<1x1x16x256xf32>,
    return
  }
  func.func @transform_0(%arg0: i32, %arg1: i32) -> (i32, i32, i32) {
    %c0_i32 = arith.constant 0 : i32
    %c0_i32_0 = arith.constant 0 : i32
    %c0_i32_1 = arith.constant 0 : i32
    %c0_i32_2 = arith.constant 0 : i32
    return %c0_i32, %c0_i32_0, %c0_i32_1 : i32, i32, i32
  }
  func.func @transform_1(%arg0: i32, %arg1: i32) -> (i32, i32, i32, i32) {
    %c0_i32 = arith.constant 0 : i32
    %c0_i32_0 = arith.constant 0 : i32
    %c0_i32_1 = arith.constant 0 : i32
    return %arg0, %arg1, %c0_i32, %c0_i32_0 : i32, i32, i32, i32
  }
  func.func @transform_2(%arg0: i32, %arg1: i32) -> (i32, i32, i32, i32) {
    %c0_i32 = arith.constant 0 : i32
    %c0_i32_0 = arith.constant 0 : i32
    %c0_i32_1 = arith.constant 0 : i32
    return %arg0, %arg1, %c0_i32, %c0_i32_0 : i32, i32, i32, i32
  }
}

</mosaic_0001>

<bundles_post_ra>
// kernel: meta_upsampler_forward.2
= control target key start
LH: loop header
LB: loop body
LE: loop exit
PB: predicated region body
PF: predicated region fallthrough
CT: control target
= control target key end

     0   :  { %10 = vsyncpa [#allocation3], 0  ;;  %s483_s0 = inlined_call_operand.hbm [shape: f32[8,8], index: 0, kind: input, shape index: {}]   ;;  %s484_s1 = inlined_call_operand.vmem [shape: f32[8,256], index: 1, kind: input, shape index: {}]   ;;  %s485_s2 = inlined_call_operand.hbm [shape: f32[1,256], index: 2, kind: input, shape index: {}]   ;;  %s486_s3 = inlined_call_operand.vmem [shape: f32[256,128], index: 3, kind: input, shape index: {}]   ;;  %s487_s4 = inlined_call_operand.vmem [shape: f32[1,128], index: 4, kind: input, shape index: {}]   ;;  %s488_s5 = inlined_call_operand.vmem [shape: f32[8,128], index: 5, kind: output, shape index: {}]  }
   0x1   :  { %11 = vsyncpa [#allocation5], 0  ;;  %s336_s18 = smov [#allocation2]   ;;  %s337_s20 = smov [#allocation4]  }
   0x2   :  { %s18_s19 = sshll.u32 %s336_s18, 4  ;;  %s30_s21 = sshll.u32 %s337_s20, 4  ;;  %s19_s19 = int_to_ptr.vmem [resolvable:$true] %s18_s19  ;;  %s31_s21 = int_to_ptr.vmem [resolvable:$true] %s30_s21 }
   0x3   :  { %s300_s22 = scalar_lea.vmem %s19_s19, 128  ;;  %p305_p1 = scmp.lt.s32.totalorder %s19_s19, %s19_s19 }
   0x4   :  { %p301_p0 = scmp.ne.s32.totalorder %s19_s19, %s300_s22  ;;  %p306_p2 = scmp.lt.s32.totalorder %s300_s22, %s300_s22 }
   0x6   :  { %p307_p3 = por %p306_p2, %p305_p1 }
   0x8   :  { %p308_p4 = pnand %p307_p3, %p301_p0 }
   0xa   :  { %311 = shalt.err (!%p308_p4)
}
   0xb   :  { %21 = dma.hbm_to_vmem [thread:$0]  %s483_s0, 128, %s19_s19, [#allocation3]  }
   0xc   :  { %s320_s25 = scalar_lea.vmem %s31_s21, 32  ;;  %p325_p6 = scmp.lt.s32.totalorder %s31_s21, %s31_s21 }
   0xd   :  { %p321_p5 = scmp.ne.s32.totalorder %s31_s21, %s320_s25  ;;  %p326_p7 = scmp.lt.s32.totalorder %s320_s25, %s320_s25 }
   0xf   :  { %p327_p8 = por %p326_p7, %p325_p6 }
  0x11   :  { %p328_p9 = pnand %p327_p8, %p321_p5 }
  0x13   :  { %331 = shalt.err (!%p328_p9)
}
  0x14   :  { %33 = dma.hbm_to_vmem [thread:$0]  %s485_s2, 32, %s31_s21, [#allocation5]  }
  0x15   :  { %332 = dma.done.wait [#allocation3], 128  }
  0x16   :  { %333 = vsyncadd [#allocation3], 4294967168 }
  0x17   :  { %334 = dma.done.wait [#allocation5], 32  }
  0x18   :  { %335 = vsyncadd [#allocation5], 4294967264  ;;  %v338_v0 = vmov 0.0   ;;  %v46_v1 = vld [vmem:[%s484_s1 + $0x8] sm:$0xff]  ;;  %v45_v2 = vld [vmem:[%s484_s1] sm:$0xff]  ;;  %vm59_vm0 = vcmask 64512   ;;  %v49_v36 = vlaneseq }
  0x19   :  { %127 = vmatprep.mubr.f32.mxu0 %v338_v0  ;;  %v44_v3 = vld [vmem:[#allocation2] sm:$0xff]  ;;  %93 = vmatprep.subr.mxu0 %v46_v1  ;;  %v167_v4 = vld [vmem:[%s486_s3 + $0xf8] sm:$0xff]  ;;  %v166_v6 = vld [vmem:[%s486_s3 + $0xf0] sm:$0xff] }
  0x1a   :  { %v151_v5 = vld [vmem:[%s486_s3 + $0x78] sm:$0xff]  ;;  %94 = vmatpush1.msra.mxu0 %v45_v2  ;;  %254 = vmatprep.subr.mxu1 %v167_v4  ;;  %v150_v7 = vld [vmem:[%s486_s3 + $0x70] sm:$0xff]  ;;  %v165_v8 = vld [vmem:[%s486_s3 + $0xe8] sm:$0xff]  ;;  %v50_v37 = vshrl.u32 %v49_v36, 7 }
  0x1b   :  { %252 = vmatmul.mubr.msk.f32.vlgmr.msra.gmra.mxu0 %vm59_vm0, %v44_v3  ;;  %255 = vmatpush3.msra.mxu1 %v151_v5  ;;  %v149_v9 = vld [vmem:[%s486_s3 + $0x68] sm:$0xff]  ;;  %v164_v10 = vld [vmem:[%s486_s3 + $0xe0] sm:$0xff]  ;;  %v163_v12 = vld [vmem:[%s486_s3 + $0xd8] sm:$0xff] }
  0x1c   :  { %256 = vmatprep.subr.mxu1 %v166_v6  ;;  %v148_v11 = vld [vmem:[%s486_s3 + $0x60] sm:$0xff]  ;;  %v147_v13 = vld [vmem:[%s486_s3 + $0x58] sm:$0xff]  ;;  %v162_v14 = vld [vmem:[%s486_s3 + $0xd0] sm:$0xff]  ;;  %v51_v38 = vsub.s32 0, %v50_v37  ;;  %v55_v40 = vsub.s32 1, %v50_v37 }
  0x1d   :  { %257 = vmatpush3.msra.mxu1 %v150_v7  ;;  %v146_v15 = vld [vmem:[%s486_s3 + $0x50] sm:$0xff]  ;;  %v161_v16 = vld [vmem:[%s486_s3 + $0xc8] sm:$0xff]  ;;  %v160_v18 = vld [vmem:[%s486_s3 + $0xc0] sm:$0xff] }
  0x1e   :  { %258 = vmatprep.subr.mxu1 %v165_v8  ;;  %v145_v17 = vld [vmem:[%s486_s3 + $0x48] sm:$0xff]  ;;  %v144_v19 = vld [vmem:[%s486_s3 + $0x40] sm:$0xff]  ;;  %v159_v20 = vld [vmem:[%s486_s3 + $0xb8] sm:$0xff] }
  0x1f   :  { %259 = vmatpush3.msra.mxu1 %v149_v9  ;;  %v143_v21 = vld [vmem:[%s486_s3 + $0x38] sm:$0xff]  ;;  %v158_v22 = vld [vmem:[%s486_s3 + $0xb0] sm:$0xff]  ;;  %v157_v24 = vld [vmem:[%s486_s3 + $0xa8] sm:$0xff] }
  0x20   :  { %260 = vmatprep.subr.mxu1 %v164_v10  ;;  %v142_v23 = vld [vmem:[%s486_s3 + $0x30] sm:$0xff]  ;;  %v141_v25 = vld [vmem:[%s486_s3 + $0x28] sm:$0xff]  ;;  %v156_v26 = vld [vmem:[%s486_s3 + $0xa0] sm:$0xff] }
  0x21   :  { %261 = vmatpush3.msra.mxu1 %v148_v11  ;;  %v140_v27 = vld [vmem:[%s486_s3 + $0x20] sm:$0xff]  ;;  %v155_v28 = vld [vmem:[%s486_s3 + $0x98] sm:$0xff]  ;;  %v154_v30 = vld [vmem:[%s486_s3 + $0x90] sm:$0xff] }
  0x22   :  { %262 = vmatprep.subr.mxu1 %v163_v12  ;;  %v139_v29 = vld [vmem:[%s486_s3 + $0x18] sm:$0xff]  ;;  %v138_v31 = vld [vmem:[%s486_s3 + $0x10] sm:$0xff]  ;;  %v153_v32 = vld [vmem:[%s486_s3 + $0x88] sm:$0xff] }
  0x23   :  { %263 = vmatpush3.msra.mxu1 %v147_v13  ;;  %v137_v33 = vld [vmem:[%s486_s3 + $0x8] sm:$0xff]  ;;  %v152_v34 = vld [vmem:[%s486_s3 + $0x80] sm:$0xff] }
  0x24   :  { %264 = vmatprep.subr.mxu1 %v162_v14  ;;  %v136_v35 = vld [vmem:[%s486_s3] sm:$0xff]  ;;  %v47_v39 = vld [vmem:[#allocation4] sm:$0x3] }
  0x25   :  { %265 = vmatpush3.msra.mxu1 %v146_v15  ;;  %v52_v41 = vrot.slane %v47_v39, %v51_v38  ;;  %v56_v42 = vrot.slane %v47_v39, %v55_v40  ;;  %v253_v50 = vld [vmem:[%s487_s4] ss:$0 sm:$0xff] }
  0x26   :  { %266 = vmatprep.subr.mxu1 %v161_v16 }
  0x27   :  { %267 = vmatpush3.msra.mxu1 %v145_v17 }
  0x28   :  { %268 = vmatprep.subr.mxu1 %v160_v18 }
  0x29   :  { %269 = vmatpush3.msra.mxu1 %v144_v19 }
  0x2a   :  { %270 = vmatprep.subr.mxu1 %v159_v20 }
  0x2b   :  { %271 = vmatpush3.msra.mxu1 %v143_v21 }
  0x2c   :  { %272 = vmatprep.subr.mxu1 %v158_v22 }
  0x2d   :  { %273 = vmatpush3.msra.mxu1 %v142_v23 }
  0x2e   :  { %274 = vmatprep.subr.mxu1 %v157_v24 }
  0x2f   :  { %275 = vmatpush3.msra.mxu1 %v141_v25 }
  0x30   :  { %276 = vmatprep.subr.mxu1 %v156_v26 }
  0x31   :  { %277 = vmatpush3.msra.mxu1 %v140_v27 }
  0x32   :  { %278 = vmatprep.subr.mxu1 %v155_v28 }
  0x33   :  { %279 = vmatpush3.msra.mxu1 %v139_v29 }
  0x34   :  { %280 = vmatprep.subr.mxu1 %v154_v30 }
  0x35   :  { %281 = vmatpush3.msra.mxu1 %v138_v31 }
  0x36   :  { %282 = vmatprep.subr.mxu1 %v153_v32 }
  0x37   :  { %283 = vmatpush3.msra.mxu1 %v137_v33 }
  0x38   :  { %284 = vmatprep.subr.mxu1 %v152_v34 }
  0x39   :  { %285 = vmatpush3.msra.mxu1 %v136_v35 }
  0xdb   :  { %v129_v43 = vpop.f32.mrf.mxu0 }
  0xdc   :  { %v130_v44 = vadd.f32 %v129_v43, %v52_v41 }
  0xdd   :  { %v131_v45 = vpop.f32.mrf.mxu0 }
  0xde   :  { %v132_v46 = vadd.f32 %v131_v45, %v56_v42  ;;  %v134_v48 = vmax.f32 %v130_v44, 0.0 }
  0xe0   :  { %v135_v47 = vmax.f32 %v132_v46, 0.0 }
  0xe2   :  { %239 = vmatprep.mubr.f32.mxu1 %v135_v47 }
  0xe3   :  { %240 = vmatmul.mubr.f32.vlgmr.msra.gmra.mxu1 %v134_v48 }
 0x1a3   :  { %v286_v49 = vpop.f32.mrf.mxu1 }
 0x1a5   :  { %v287_v51 = vpop.f32.mrf.mxu1 }
 0x1a6   :  { %v288_v52 = vadd.f32 %v287_v51, %v286_v49 }
 0x1a8   :  { %v242_v53 = vadd.f32 %v288_v52, %v253_v50 }
 0x1aa   :  { %245 = vst [vmem:[%s488_s5] sm:$0xff] %v242_v53 }
 0x1ab   :  { %250 = vsyncpa [#allocation3], 1 }
 0x1ac   :  { %251 = vsyncpa [#allocation5], 1 }

// kernel: meta_upsampler_forward.3
= control target key start
LH: loop header
LB: loop body
LE: loop exit
PB: predicated region body
PF: predicated region fallthrough
CT: control target
= control target key end

     0   :  { %s1359_s9 = smov 0   ;;  %s1361_s10 = smov 0   ;;  %s1582_s0 = inlined_call_operand.vmem [shape: f32[9,16,8], index: 0, kind: input, shape index: {}]   ;;  %s1583_s1 = inlined_call_operand.vmem [shape: f32[2,2,8,256], index: 1, kind: input, shape index: {}]   ;;  %s1584_s2 = inlined_call_operand.vmem [shape: f32[2,2,16,256], index: 2, kind: output, shape index: {}]  }
   0x1   :  { %s1363_s11 = smov 0   ;;  %s1365_s12 = smov 0  }
   0x2   :  { %s1367_s13 = smov 0  }
   0x3 LB: > { %s21_s14 = sadd.s32 1, %s1325_s11  ;;  %s24_s15 = sadd.s32 1, %s1329_s12  ;;  %s1333_s13 = sphi %s1367_s13, %s12_s13   ;;  %s1329_s12 = sphi %s1365_s12, %s1588_s12   ;;  %s1325_s11 = sphi %s1363_s11, %s1587_s11   ;;  %s1321_s10 = sphi %s1361_s10, %s1586_s10   ;;  %s1317_s9 = sphi %s1359_s9, %s1585_s9  }
   0x4   : > { %p22_p0 = scmp.ge.s32.totalorder %s21_s14, 2  ;;  %p1201_p1 = scmp.ge.s32.totalorder %s1333_s13, 1 }
   0x5   : > { %p132_p2 = scmp.lt.s32.totalorder %s1333_s13, 5 }
   0x6   : > { %s1590_s14 = smov (%p22_p0, %s21_s14), 0  ;;  %s1592_s15 = smov (!%p22_p0, %s24_s15), %s1329_s12 }
   0x7   : > { %p133_p3 = pnand %p1201_p1, %p132_p2  ;;  %p26_p4 = scmp.ge.s32.totalorder %s1592_s15, 2 }
   0x8   : > { %p162_p5 = scmp.lt.s32.totalorder (!%p133_p3), %s1321_s10, 1  ;;  %p164_p6 = scmp.lt.s32.totalorder (!%p133_p3), %s1317_s9, 1 }
   0x9   : > { %s1594_s15 = smov (%p26_p4, %s1592_s15), 0  ;;  %136 = sbr.rel (%p133_p3) target bundleno = 396 (0x18c), region = 28 }
   0xa   : > { %s1339_s20 = smov (!%p133_p3), 1   ;;  %s1340_s21 = smov (!%p133_p3), 127  }
   0xb   : > { %s1342_s23 = smov (!%p133_p3), 110   ;;  %s1343_s24 = smov (!%p133_p3), 109  }
   0xe   : > { %v1335_v0 = vmov 0.0   ;;  %s1596_s10 = smov (!%p162_p5, %s1321_s10), 1  ;;  %s1598_s9 = smov (!%p164_p6, %s1317_s9), 1  ;;  %v182_v1 = vld [vmem:[%s1582_s0] sm:$0xff]  ;;  %vm184_vm0 = vcmask 64512   ;;  %v183_v4 = vld [vmem:[%s1582_s0 + $0x8] sm:$0xff] }
   0xf   : > { %255 = vmatprep.mubr.f32.mxu0 %v1335_v0  ;;  %261 = vmatprep.mubr.f32.mxu1 %v1335_v0  ;;  %s1203_s16 = sshll.u32 %s1596_s10, 2  ;;  %s1202_s17 = sshll.u32 %s1598_s9, 1  ;;  %v1210_v5 = vld [vmem:[%s1582_s0 + $0x10] sm:$0xff]  ;;  %v1214_v6 = vld [vmem:[%s1582_s0 + $0x20] sm:$0xff]  ;;  %v1211_v7 = vld [vmem:[%s1582_s0 + $0x18] sm:$0xff] }
  0x10   : > { %s168_s18 = sadd.s32 %s1203_s16, %s1202_s17  ;;  %v1215_v8 = vld [vmem:[%s1582_s0 + $0x28] sm:$0xff]  ;;  %v1218_v9 = vld [vmem:[%s1582_s0 + $0x30] sm:$0xff]  ;;  %v1222_v10 = vld [vmem:[%s1582_s0 + $0x40] sm:$0xff]  ;;  %s1336_s17 = smov 19  }
  0x11   : > { %s1204_s19 = sshll.u32 %s168_s18, 3  ;;  %v1219_v11 = vld [vmem:[%s1582_s0 + $0x38] sm:$0xff]  ;;  %v1223_v12 = vld [vmem:[%s1582_s0 + $0x48] sm:$0xff]  ;;  %v1226_v13 = vld [vmem:[%s1582_s0 + $0x50] sm:$0xff]  ;;  %s1337_s18 = smov 18  }
  0x12   : > { %s170_s22 = scalar_lea.vmem %s1583_s1, %s1204_s19  ;;  %v1230_v14 = vld [vmem:[%s1582_s0 + $0x60] sm:$0xff]  ;;  %v1227_v15 = vld [vmem:[%s1582_s0 + $0x58] sm:$0xff]  ;;  %v1231_v16 = vld [vmem:[%s1582_s0 + $0x68] sm:$0xff]  ;;  %s1338_s19 = smov 17  }
  0x13   : > { %v181_v2 = vld [vmem:[%s170_s22 + $0x8] sm:$0xff]  ;;  %v180_v3 = vld [vmem:[%s170_s22] sm:$0xff]  ;;  %v1234_v17 = vld [vmem:[%s1582_s0 + $0x70] sm:$0xff]  ;;  %s1341_s22 = smov 111   ;;  %s1205_s25 = sshll.u32 %s1598_s9, 2 }
  0x14   : > { %221 = vmatprep.subr.mxu0 %v181_v2  ;;  %1244 = vmatprep.subr.mxu1 %v181_v2  ;;  %v1238_v18 = vld [vmem:[%s1582_s0 + $0x80] sm:$0xff]  ;;  %v1235_v19 = vld [vmem:[%s1582_s0 + $0x78] sm:$0xff]  ;;  %v1239_v20 = vld [vmem:[%s1582_s0 + $0x88] sm:$0xff]  ;;  %s1206_s26 = sshll.u32 %s1596_s10, 3 }
  0x15   : > { %222 = vmatpush1.msra.mxu0 %v180_v3  ;;  %1245 = vmatpush1.msra.mxu1 %v180_v3  ;;  %s177_s9 = sadd.s32 %s1206_s26, %s1205_s25 }
  0x16   : > { %1208 = vmatmul.mubr.msk.f32.vlgmr.msra.gmra.mxu0 %vm184_vm0, %v182_v1  ;;  %1209 = vmatmul.mubr.msk.f32.vlgmr.msra.gmra.mxu1 %vm184_vm0, %v183_v4  ;;  %s1207_s10 = sshll.u32 %s177_s9, 3 }
  0x17   : > { %326 = vmatprep.subr.mxu1 %v181_v2  ;;  %360 = vmatprep.mubr.f32.mxu1 %v1335_v0  ;;  %s179_s29 = scalar_lea.vmem %s1584_s2, %s1207_s10 }
  0x18   : > { %327 = vmatpush1.msra.mxu1 %v180_v3  ;;  %429 = vmatprep.subr.mxu0 %v181_v2 }
  0x19   : > { %430 = vmatpush1.msra.mxu0 %v180_v3  ;;  %463 = vmatprep.mubr.f32.mxu0 %v1335_v0 }
  0x1a   : > { %1212 = vmatmul.mubr.msk.f32.vlgmr.msra.gmra.mxu1 %vm184_vm0, %v1210_v5  ;;  %1216 = vmatmul.mubr.msk.f32.vlgmr.msra.gmra.mxu0 %vm184_vm0, %v1214_v6 }
  0x1b   : > { %366 = vmatprep.mubr.f32.mxu1 %v1335_v0  ;;  %469 = vmatprep.mubr.f32.mxu0 %v1335_v0 }
  0x1c   : > { %532 = vmatprep.subr.mxu1 %v181_v2  ;;  %635 = vmatprep.subr.mxu0 %v181_v2 }
  0x1d   : > { %533 = vmatpush1.msra.mxu1 %v180_v3  ;;  %636 = vmatpush1.msra.mxu0 %v180_v3 }
  0x1e   : > { %1213 = vmatmul.mubr.msk.f32.gmra.mxu1 %vm184_vm0, %v1211_v7  ;;  %1217 = vmatmul.mubr.msk.f32.gmra.mxu0 %vm184_vm0, %v1215_v8 }
  0x1f   : > { %566 = vmatprep.mubr.f32.mxu1 %v1335_v0  ;;  %725 = vmatprep.subr.mxu1 %v181_v2 }
  0x20   : > { %669 = vmatprep.mubr.f32.mxu0 %v1335_v0  ;;  %828 = vmatprep.subr.mxu0 %v181_v2 }
  0x22   : > { %1220 = vmatmul.mubr.msk.f32.vlgmr.msra.gmra.mxu1 %vm184_vm0, %v1218_v9  ;;  %1224 = vmatmul.mubr.msk.f32.vlgmr.msra.gmra.mxu0 %vm184_vm0, %v1222_v10  ;;  %v276_v10 = vlaneseq }
  0x23   : > { %726 = vmatpush1.msra.mxu1 %v180_v3  ;;  %572 = vmatprep.mubr.f32.mxu1 %v1335_v0 }
  0x24   : > { %829 = vmatpush1.msra.mxu0 %v180_v3  ;;  %675 = vmatprep.mubr.f32.mxu0 %v1335_v0 }
  0x25   : > { %931 = vmatprep.subr.mxu1 %v181_v2  ;;  %1034 = vmatprep.subr.mxu0 %v181_v2 }
  0x26   : > { %1221 = vmatmul.mubr.msk.f32.gmra.mxu1 %vm184_vm0, %v1219_v11  ;;  %1225 = vmatmul.mubr.msk.f32.gmra.mxu0 %vm184_vm0, %v1223_v12 }
  0x27   : > { %759 = vmatprep.mubr.f32.mxu1 %v1335_v0  ;;  %862 = vmatprep.mubr.f32.mxu0 %v1335_v0 }
  0x2a   : > { %1228 = vmatmul.mubr.msk.f32.vlgmr.msra.gmra.mxu1 %vm184_vm0, %v1226_v13  ;;  %1232 = vmatmul.mubr.msk.f32.vlgmr.msra.gmra.mxu0 %vm184_vm0, %v1230_v14  ;;  %v1496_v13 = vand.u32 127, %v276_v10 }
  0x2b   : > { %765 = vmatprep.mubr.f32.mxu1 %v1335_v0  ;;  %868 = vmatprep.mubr.f32.mxu0 %v1335_v0 }
  0x2c   : > { %932 = vmatpush1.msra.mxu1 %v180_v3  ;;  %1035 = vmatpush1.msra.mxu0 %v180_v3  ;;  %vm381_vm1 = vcmp.lt.s32.totalorder %v1496_v13, 18  ;;  %vm278_vm2 = vcmp.lt.s32.totalorder %v1496_v13, 19  ;;  %vm484_vm3 = vcmp.lt.s32.totalorder %v1496_v13, 17  ;;  %vm587_vm4 = vcmp.lt.s32.totalorder %v1496_v13, 1 }
  0x2d   : > { %vm780_vm5 = vcmp.lt.s32.totalorder %v1496_v13, 127  ;;  %vm883_vm6 = vcmp.lt.s32.totalorder %v1496_v13, 111  ;;  %vm986_vm7 = vcmp.lt.s32.totalorder %v1496_v13, 110  ;;  %vm1089_vm8 = vcmp.lt.s32.totalorder %v1496_v13, 109 }
  0x2e   : > { %1229 = vmatmul.mubr.msk.f32.gmra.mxu1 %vm184_vm0, %v1227_v15  ;;  %1233 = vmatmul.mubr.msk.f32.gmra.mxu0 %vm184_vm0, %v1231_v16 }
  0x2f   : > { %965 = vmatprep.mubr.f32.mxu1 %v1335_v0  ;;  %1068 = vmatprep.mubr.f32.mxu0 %v1335_v0 }
  0x32   : > { %1236 = vmatmul.mubr.msk.f32.vlgmr.msra.gmra.mxu1 %vm184_vm0, %v1234_v17  ;;  %1240 = vmatmul.mubr.msk.f32.vlgmr.msra.gmra.mxu0 %vm184_vm0, %v1238_v18 }
  0x33   : > { %971 = vmatprep.mubr.f32.mxu1 %v1335_v0  ;;  %1074 = vmatprep.mubr.f32.mxu0 %v1335_v0 }
  0x36   : > { %1237 = vmatmul.mubr.msk.f32.gmra.mxu1 %vm184_vm0, %v1235_v19  ;;  %1241 = vmatmul.mubr.msk.f32.gmra.mxu0 %vm184_vm0, %v1239_v20 }
  0xd6   : > { %v257_v21 = vpop.f32.mrf.mxu0  ;;  %v263_v22 = vpop.f32.mrf.mxu1 }
  0xd7   : > { %268 = vrot.lane.b32.xlu0 %v257_v21, %s1336_s17 }
  0xd8   : > { %v259_v23 = vpop.f32.mrf.mxu0  ;;  %v265_v24 = vpop.f32.mrf.mxu1 }
  0xd9   : > { %272 = vrot.lane.b32.xlu1 %v259_v23, %s1336_s17 }
  0xda   : > { %v362_v25 = vpop.f32.mrf.mxu1  ;;  %v465_v26 = vpop.f32.mrf.mxu0 }
  0xdb   : > { %270 = vrot.lane.b32.xlu0 %v263_v22, %s1336_s17 }
  0xdc   : > { %v364_v27 = vpop.f32.mrf.mxu1  ;;  %v467_v28 = vpop.f32.mrf.mxu0 }
  0xdd   : > { %274 = vrot.lane.b32.xlu1 %v265_v24, %s1336_s17 }
  0xde   : > { %v368_v29 = vpop.f32.mrf.mxu1  ;;  %v471_v30 = vpop.f32.mrf.mxu0 }
  0xdf   : > { %373 = vrot.lane.b32.xlu0 %v362_v25, %s1337_s18 }
  0xe0   : > { %v370_v31 = vpop.f32.mrf.mxu1  ;;  %v473_v32 = vpop.f32.mrf.mxu0 }
  0xe1   : > { %375 = vrot.lane.b32.xlu1 %v368_v29, %s1337_s18 }
  0xe2   : > { %v568_v33 = vpop.f32.mrf.mxu1  ;;  %v1488_v35 = vpop.f32.mrf.mxu0 }
  0xe3   : > { %476 = vrot.lane.b32.xlu0 %v465_v26, %s1338_s19 }
  0xe4   : > { %v570_v34 = vpop.f32.mrf.mxu1  ;;  %v1490_v37 = vpop.f32.mrf.mxu0 }
  0xe5   : > { %478 = vrot.lane.b32.xlu1 %v471_v30, %s1338_s19 }
  0xe6   : > { %v574_v36 = vpop.f32.mrf.mxu1  ;;  %v1492_v39 = vpop.f32.mrf.mxu0 }
  0xe7   : > { %377 = vrot.lane.b32.xlu0 %v364_v27, %s1337_s18 }
  0xe8   : > { %v576_v38 = vpop.f32.mrf.mxu1  ;;  %v1494_v41 = vpop.f32.mrf.mxu0 }
  0xe9   : > { %379 = vrot.lane.b32.xlu1 %v370_v31, %s1337_s18 }
  0xea   : > { %v761_v40 = vpop.f32.mrf.mxu1  ;;  %v864_v43 = vpop.f32.mrf.mxu0 }
  0xeb   : > { %480 = vrot.lane.b32.xlu0 %v467_v28, %s1338_s19 }
  0xec   : > { %v763_v42 = vpop.f32.mrf.mxu1  ;;  %v866_v45 = vpop.f32.mrf.mxu0 }
  0xed   : > { %482 = vrot.lane.b32.xlu1 %v473_v32, %s1338_s19 }
  0xee   : > { %v767_v44 = vpop.f32.mrf.mxu1  ;;  %v870_v46 = vpop.f32.mrf.mxu0 }
  0xef   : > { %579 = vrot.lane.b32.xlu0 %v568_v33, %s1339_s20 }
  0xf0   : > { %v769_v47 = vpop.f32.mrf.mxu1  ;;  %v872_v49 = vpop.f32.mrf.mxu0 }
  0xf1   : > { %581 = vrot.lane.b32.xlu1 %v574_v36, %s1339_s20 }
  0xf2   : > { %v967_v48 = vpop.f32.mrf.mxu1  ;;  %v1070_v51 = vpop.f32.mrf.mxu0 }
  0xf3   : > { %583 = vrot.lane.b32.xlu0 %v570_v34, %s1339_s20 }
  0xf4   : > { %v969_v50 = vpop.f32.mrf.mxu1  ;;  %v1072_v53 = vpop.f32.mrf.mxu0 }
  0xf5   : > { %585 = vrot.lane.b32.xlu1 %v576_v38, %s1339_s20 }
  0xf6   : > { %v973_v52 = vpop.f32.mrf.mxu1  ;;  %v1076_v54 = vpop.f32.mrf.mxu0 }
  0xf7   : > { %772 = vrot.lane.b32.xlu0 %v761_v40, %s1340_s21 }
  0xf8   : > { %v975_v55 = vpop.f32.mrf.mxu1  ;;  %v1078_v56 = vpop.f32.mrf.mxu0 }
  0xf9   : > { %774 = vrot.lane.b32.xlu1 %v767_v44, %s1340_s21 }
  0xfb   : > { %875 = vrot.lane.b32.xlu0 %v864_v43, %s1341_s22 }
  0xfd   : > { %877 = vrot.lane.b32.xlu1 %v870_v46, %s1341_s22 }
  0xff   : > { %776 = vrot.lane.b32.xlu0 %v763_v42, %s1340_s21 }
 0x101   : > { %778 = vrot.lane.b32.xlu1 %v769_v47, %s1340_s21 }
 0x103   : > { %879 = vrot.lane.b32.xlu0 %v866_v45, %s1341_s22 }
 0x105   : > { %881 = vrot.lane.b32.xlu1 %v872_v49, %s1341_s22 }
 0x107   : > { %978 = vrot.lane.b32.xlu0 %v967_v48, %s1342_s23 }
 0x109   : > { %980 = vrot.lane.b32.xlu1 %v973_v52, %s1342_s23 }
 0x10b   : > { %1081 = vrot.lane.b32.xlu0 %v1070_v51, %s1343_s24 }
 0x10d   : > { %1083 = vrot.lane.b32.xlu1 %v1076_v54, %s1343_s24 }
 0x10f   : > { %982 = vrot.lane.b32.xlu0 %v969_v50, %s1342_s23 }
 0x111   : > { %984 = vrot.lane.b32.xlu1 %v975_v55, %s1342_s23 }
 0x113   : > { %1085 = vrot.lane.b32.xlu0 %v1072_v53, %s1343_s24 }
 0x115   : > { %1087 = vrot.lane.b32.xlu1 %v1078_v56, %s1343_s24 }
 0x149   : > { %v269_v57 = vpop.permute.xlu0 %268 }
 0x14b   : > { %v273_v58 = vpop.permute.xlu1 %272 }
 0x14c   : > { %v279_v19 = vsel %vm278_vm2, %v269_v57, %v273_v58  ;;  %v281_v20 = vsel %vm278_vm2, %v273_v58, %v269_v57 }
 0x14d   : > { %v271_v59 = vpop.permute.xlu0 %270 }
 0x14f   : > { %v275_v60 = vpop.permute.xlu1 %274 }
 0x150   : > { %v280_v26 = vsel %vm278_vm2, %v271_v59, %v275_v60  ;;  %v282_v27 = vsel %vm278_vm2, %v275_v60, %v271_v59 }
 0x151   : > { %v374_v61 = vpop.permute.xlu0 %373 }
 0x153   : > { %v376_v62 = vpop.permute.xlu1 %375 }
 0x155   : > { %v477_v63 = vpop.permute.xlu0 %476 }
 0x157   : > { %v479_v0 = vpop.permute.xlu1 %478 }
 0x159   : > { %v378_v1 = vpop.permute.xlu0 %377 }
 0x15a   : > { %v382_v17 = vsel %vm381_vm1, %v374_v61, %v378_v1  ;;  %v384_v18 = vsel %vm381_vm1, %v378_v1, %v374_v61 }
 0x15b   : > { %v380_v2 = vpop.permute.xlu1 %379  ;;  %v386_v28 = vadd.f32 %v384_v18, %v281_v20  ;;  %v387_v29 = vadd.f32 %v382_v17, %v279_v19 }
 0x15c   : > { %v383_v22 = vsel %vm381_vm1, %v376_v62, %v380_v2  ;;  %v385_v23 = vsel %vm381_vm1, %v380_v2, %v376_v62 }
 0x15d   : > { %v481_v3 = vpop.permute.xlu0 %480  ;;  %v388_v36 = vadd.f32 %v385_v23, %v282_v27  ;;  %v389_v38 = vadd.f32 %v383_v22, %v280_v26 }
 0x15e   : > { %v485_v24 = vsel %vm484_vm3, %v477_v63, %v481_v3  ;;  %v487_v25 = vsel %vm484_vm3, %v481_v3, %v477_v63 }
 0x15f   : > { %v483_v4 = vpop.permute.xlu1 %482  ;;  %v489_v40 = vadd.f32 %v487_v25, %v386_v28  ;;  %v490_v42 = vadd.f32 %v485_v24, %v387_v29 }
 0x160   : > { %v486_v31 = vsel %vm484_vm3, %v479_v0, %v483_v4  ;;  %v488_v32 = vsel %vm484_vm3, %v483_v4, %v479_v0 }
 0x161   : > { %v580_v5 = vpop.permute.xlu0 %579  ;;  %v491_v46 = vadd.f32 %v488_v32, %v388_v36  ;;  %v492_v47 = vadd.f32 %v486_v31, %v389_v38 }
 0x163   : > { %v582_v6 = vpop.permute.xlu1 %581 }
 0x165   : > { %v584_v7 = vpop.permute.xlu0 %583 }
 0x166   : > { %v588_v33 = vsel %vm587_vm4, %v580_v5, %v584_v7  ;;  %v590_v34 = vsel %vm587_vm4, %v584_v7, %v580_v5 }
 0x167   : > { %v586_v8 = vpop.permute.xlu1 %585  ;;  %v592_v48 = vadd.f32 %v590_v34, %v489_v40  ;;  %v593_v49 = vadd.f32 %v588_v33, %v490_v42 }
 0x168   : > { %v589_v44 = vsel %vm587_vm4, %v582_v6, %v586_v8  ;;  %v591_v45 = vsel %vm587_vm4, %v586_v8, %v582_v6 }
 0x169   : > { %v773_v9 = vpop.permute.xlu0 %772  ;;  %v594_v51 = vadd.f32 %v591_v45, %v491_v46  ;;  %v595_v52 = vadd.f32 %v589_v44, %v492_v47  ;;  %v682_v56 = vadd.f32 %v1488_v35, %v592_v48  ;;  %v683_v57 = vadd.f32 %v1490_v37, %v593_v49 }
 0x16b   : > { %v775_v11 = vpop.permute.xlu1 %774  ;;  %v684_v63 = vadd.f32 %v1492_v39, %v594_v51  ;;  %v685_v0 = vadd.f32 %v1494_v41, %v595_v52 }
 0x16d   : > { %v876_v12 = vpop.permute.xlu0 %875 }
 0x16f   : > { %v1498_v14 = vpop.permute.xlu1 %877 }
 0x171   : > { %v777_v15 = vpop.permute.xlu0 %776 }
 0x172   : > { %v781_v54 = vsel %vm780_vm5, %v773_v9, %v777_v15  ;;  %v783_v55 = vsel %vm780_vm5, %v777_v15, %v773_v9 }
 0x173   : > { %v779_v16 = vpop.permute.xlu1 %778  ;;  %v785_v35 = vadd.f32 %v781_v54, %v682_v56  ;;  %v786_v37 = vadd.f32 %v783_v55, %v683_v57 }
 0x174   : > { %v782_v59 = vsel %vm780_vm5, %v775_v11, %v779_v16  ;;  %v784_v60 = vsel %vm780_vm5, %v779_v16, %v775_v11 }
 0x175   : > { %v880_v21 = vpop.permute.xlu0 %879  ;;  %v787_v6 = vadd.f32 %v782_v59, %v684_v63  ;;  %v788_v7 = vadd.f32 %v784_v60, %v685_v0 }
 0x176   : > { %v884_v61 = vsel %vm883_vm6, %v876_v12, %v880_v21  ;;  %v886_v62 = vsel %vm883_vm6, %v880_v21, %v876_v12 }
 0x177   : > { %v882_v30 = vpop.permute.xlu1 %881  ;;  %v888_v39 = vadd.f32 %v884_v61, %v785_v35  ;;  %v889_v8 = vadd.f32 %v886_v62, %v786_v37 }
 0x178   : > { %v885_v2 = vsel %vm883_vm6, %v1498_v14, %v882_v30  ;;  %v887_v3 = vsel %vm883_vm6, %v882_v30, %v1498_v14 }
 0x179   : > { %v979_v43 = vpop.permute.xlu0 %978  ;;  %v890_v11 = vadd.f32 %v885_v2, %v787_v6  ;;  %v891_v12 = vadd.f32 %v887_v3, %v788_v7 }
 0x17b   : > { %v981_v50 = vpop.permute.xlu1 %980 }
 0x17d   : > { %v1082_v53 = vpop.permute.xlu0 %1081 }
 0x17f   : > { %v1084_v58 = vpop.permute.xlu1 %1083 }
 0x181   : > { %v983_v1 = vpop.permute.xlu0 %982 }
 0x182   : > { %v987_v4 = vsel %vm986_vm7, %v979_v43, %v983_v1  ;;  %v989_v5 = vsel %vm986_vm7, %v983_v1, %v979_v43 }
 0x183   : > { %v985_v41 = vpop.permute.xlu1 %984  ;;  %v991_v14 = vadd.f32 %v987_v4, %v888_v39  ;;  %v992_v15 = vadd.f32 %v989_v5, %v889_v8 }
 0x184   : > { %v988_v9 = vsel %vm986_vm7, %v981_v50, %v985_v41  ;;  %v990_v10 = vsel %vm986_vm7, %v985_v41, %v981_v50 }
 0x185   : > { %v1086_v16 = vpop.permute.xlu0 %1085  ;;  %v993_v19 = vadd.f32 %v988_v9, %v890_v11  ;;  %v994_v20 = vadd.f32 %v990_v10, %v891_v12 }
 0x186   : > { %v1090_v17 = vsel %vm1089_vm8, %v1082_v53, %v1086_v16  ;;  %v1092_v18 = vsel %vm1089_vm8, %v1086_v16, %v1082_v53 }
 0x187   : > { %v1094_v21 = vadd.f32 %v1090_v17, %v991_v14  ;;  %v1095_v22 = vadd.f32 %v1092_v18, %v992_v15  ;;  %v1088_v23 = vpop.permute.xlu1 %1087 }
 0x188   : > { %v1091_v24 = vsel %vm1089_vm8, %v1084_v58, %v1088_v23  ;;  %v1093_v25 = vsel %vm1089_vm8, %v1088_v23, %v1084_v58 }
 0x189   : > { %1098 = vst [vmem:[%s179_s29] sm:$0xff] %v1094_v21  ;;  %1099 = vst [vmem:[%s179_s29 + $0x8] sm:$0xff] %v1095_v22  ;;  %v1096_v26 = vadd.f32 %v1091_v24, %v993_v19  ;;  %v1097_v27 = vadd.f32 %v1093_v25, %v994_v20 }
 0x18b   : > { %1100 = vst [vmem:[%s179_s29 + $0x10] sm:$0xff] %v1096_v26  ;;  %1101 = vst [vmem:[%s179_s29 + $0x18] sm:$0xff] %v1097_v27 }
 0x18c PF: > { %s12_s13 = sadd.s32 1, %s1333_s13   ;;  %s1585_s9 = smov %s1325_s11 }
 0x18d   : > { %p9_p7 = scmp.ge.s32.totalorder %s12_s13, 6   ;;  %s1586_s10 = smov %s1329_s12 }
 0x18e   : > { %s1587_s11 = smov %s1590_s14  ;;  %s1588_s12 = smov %s1594_s15 }
 0x18f   :  { %11 = sbr.rel (!%p9_p7) target bundleno = 3 (0x3), region = 66 }

</bundles_post_ra>
